<compile_context>
chip_gen: v6e
topology: v6e:2x2x1
jax: 0.10.0
libtpu: 0.0.40
codegen_flags: <defaults>
</compile_context>

<pallas_src>
import functools

import jax
import jax.numpy as jnp
from jax.experimental import pallas as pl
from jax.experimental.pallas import tpu as pltpu


# Model dims (base model + surgery, matching the PyTorch spec instantiation)
D_IN, D_H, D_MID, D_REP, D_OUT = 32, 64, 64, 48, 16
LANE = 128          # lane-dense padded output width (unmasked stores)
MAX_TB = 1024       # max batch-tile rows (512-1024 ~85% of HBM roofline)


def fused_mlp_kernel(x_ref, w1_ref, b1_ref, wc_ref, bc_ref, o_ref):
    # fc1 (kept from base model): Linear(32 -> 64), bf16 MXU, f32 accumulation
    h = jnp.dot(x_ref[...], w1_ref[...],
                preferred_element_type=jnp.float32) + b1_ref[...]
    # relu child (f32 elementwise -> fine on v5e's non-bf16 VPU as well)
    h = jnp.maximum(h, 0.0)
    # folded (mid -> replaced fc2 -> head): Linear(64 -> 16), padded to 128 lanes
    o = jnp.dot(h.astype(wc_ref.dtype), wc_ref[...],
                preferred_element_type=jnp.float32) + bc_ref[...]
    # bf16 store: halves the dominant output DMA stream, still unmasked vst
    o_ref[...] = o.astype(o_ref.dtype)


def _round_up(n, m):
    return ((n + m - 1) // m) * m


def _cdiv(a, b):
    return -(-a // b)


def _num_tensorcores():
    """Heuristic: v7x exposes 2 TensorCores per device (shared via the
    'parallel' grid axis); v5e / v6e have a single TensorCore."""
    try:
        kind = jax.devices()[0].device_kind.lower()
        if "v7" in kind:
            return 2
    except Exception:
        pass
    return 1


def _pick_tiling(batch, n_cores, max_tb):
    """Derive the batch tile from B: exactly n_cores grid steps (balanced real
    work per TensorCore), more only when a tile would exceed max_tb.  Rows are
    rounded up to 16 (bf16 sublane packing), so padding stays minimal."""
    n_steps = max(n_cores, _cdiv(batch, max_tb))
    n_steps = _round_up(n_steps, n_cores)
    tb = _round_up(max(_cdiv(batch, n_steps), 1), 16)
    bp = _round_up(batch, tb)
    return tb, bp, bp // tb


def fold_params(params):
    """Fold the three consecutive post-ReLU linears (mid -> replaced fc2 ->
    head) into one Linear(64 -> 16) in f32 (exact linear composition), pad the
    output features to a full 128-lane slab, and cast weights to bf16.
    Called ONCE at init time (hoisted out of the per-call path)."""
    w1, b1, w2, b2, w3, b3, w4, b4 = params
    wc = w2 @ w3 @ w4                                  # exact f32 composition
    bc = (b2 @ w3 + b3) @ w4 + b4
    d_out = wc.shape[-1]
    wc = jnp.pad(wc, ((0, 0), (0, LANE - d_out)))
    bc = jnp.pad(bc, ((0, 0), (0, LANE - d_out)))
    folded = (w1.astype(jnp.bfloat16), b1.astype(jnp.float32),
              wc.astype(jnp.bfloat16), bc.astype(jnp.float32))
    return folded, d_out


@functools.partial(jax.jit, static_argnames=("d_out", "n_cores", "max_tb"))
def model_forward(x, w1, b1, wc, bc, *, d_out=D_OUT, n_cores=1, max_tb=MAX_TB):
    """Forward of the surgically-composed model as one fused Pallas kernel.
    Jitted so the input pad/cast, the pallas_call and the output slice/cast
    fuse into a single dispatch.

    x: (B, 32) float32; w1/b1/wc/bc: output of fold_params.
    """
    B, d_in = x.shape
    TB, Bp, steps = _pick_tiling(B, n_cores, max_tb)

    xb = x.astype(jnp.bfloat16)
    if Bp != B:
        xb = jnp.pad(xb, ((0, Bp - B), (0, 0)))

    out = pl.pallas_call(
        fused_mlp_kernel,
        out_shape=jax.ShapeDtypeStruct((Bp, LANE), jnp.bfloat16),
        grid=(steps,),
        in_specs=[
            pl.BlockSpec((TB, d_in), lambda i: (i, 0)),      # x: batch-tiled
            pl.BlockSpec((d_in, D_H), lambda i: (0, 0)),     # w1 (constant block)
            pl.BlockSpec((1, D_H), lambda i: (0, 0)),        # b1 (constant block)
            pl.BlockSpec((D_H, LANE), lambda i: (0, 0)),     # W_comb (constant)
            pl.BlockSpec((1, LANE), lambda i: (0, 0)),       # b_comb (constant)
        ],
        out_specs=pl.BlockSpec((TB, LANE), lambda i: (i, 0)),
        compiler_params=pltpu.CompilerParams(
            dimension_semantics=("parallel",)),              # megacore on v7x
    )(xb, w1, b1, wc, bc)

    # strip batch / lane padding; return f32 like the PyTorch forward
    return out[:B, :d_out].astype(jnp.float32)


def init_linear(key, fan_in, fan_out):
    """Deterministic Kaiming-uniform-style init (PyTorch nn.Linear default)."""
    kw, kb = jax.random.split(key)
    bound = 1.0 / jnp.sqrt(fan_in)
    w = jax.random.uniform(kw, (fan_in, fan_out), jnp.float32,
                           minval=-bound, maxval=bound)   # stored (in, out)
    b = jax.random.uniform(kb, (1, fan_out), jnp.float32,
                           minval=-bound, maxval=bound)
    return w, b


def reference_forward_f32(x, params):
    """Full-precision, unfolded reference (matches the PyTorch forward)."""
    w1, b1, w2, b2, w3, b3, w4, b4 = params
    h = jnp.maximum(x @ w1 + b1, 0.0)
    h = h @ w2 + b2
    h = h @ w3 + b3
    h = h @ w4 + b4
    return h


def reference_forward_exact_path(x, folded, d_out):
    """Reference mimicking the kernel numerics (folded, bf16 in / f32 acc /
    bf16 out)."""
    w1, b1, wc, bc = folded
    h = jnp.dot(x.astype(jnp.bfloat16), w1,
                preferred_element_type=jnp.float32) + b1
    h = jnp.maximum(h, 0.0)
    o = jnp.dot(h.astype(jnp.bfloat16), wc,
                preferred_element_type=jnp.float32) + bc
    return o.astype(jnp.bfloat16).astype(jnp.float32)[:, :d_out]


if __name__ == "__main__":
    key = jax.random.PRNGKey(0)
    k_x, k1, k2, k3, k4 = jax.random.split(key, 5)

    # B chosen non-multiple of the tile granularity to exercise the pad path.
    B = 300
    x = jax.random.normal(k_x, (B, D_IN), jnp.float32)

    w1, b1 = init_linear(k1, D_IN, D_H)     # fc1 (kept from base model)
    w2, b2 = init_linear(k2, D_H, D_MID)    # inserted "mid"
    w3, b3 = init_linear(k3, D_MID, D_REP)  # replacement for fc2
    w4, b4 = init_linear(k4, D_REP, D_OUT)  # appended "head"
    params = (w1, b1, w2, b2, w3, b3, w4, b4)

    # fold/pad/cast once at init (not in the per-call path)
    folded, d_out = fold_params(params)

    n_cores = _num_tensorcores()
    out = jax.block_until_ready(
        model_forward(x, *folded, d_out=d_out, n_cores=n_cores))
    assert out.shape == (B, D_OUT)

    # tight check against a reference following the kernel's exact numeric path
    ref_exact = reference_forward_exact_path(x, folded, d_out)
    assert jnp.allclose(out, ref_exact, atol=2e-2, rtol=2e-2), \
        "mismatch vs exact-path reference"

    # loose sanity check against the full-precision, unfolded PyTorch-style math
    # (bf16 in / f32 accum / bf16 out is the intended precision tradeoff)
    ref_f32 = reference_forward_f32(x, params)
    assert float(jnp.max(jnp.abs(out - ref_f32))) < 1e-1, \
        "drift vs f32 reference larger than expected"

    print("KERNEL_OK")
</pallas_src>

<mosaic_0001>
module attributes {stable_mosaic.version = 11 : i64} {
  func.func @fused_mlp_kernel(%arg0: i32, %arg1: memref<304x32xbf16, #tpu.memory_space<vmem>>, %arg2: memref<32x64xbf16, #tpu.memory_space<vmem>>, %arg3: memref<1x64xf32, #tpu.memory_space<vmem>>, %arg4: memref<64x128xbf16, #tpu.memory_space<vmem>>, %arg5: memref<1x128xf32, #tpu.memory_space<vmem>>, %arg6: memref<304x128xbf16, #tpu.memory_space<vmem>>) attributes {dimension_semantics = [#tpu.dimension_semantics<parallel>], iteration_bounds = array<i64: 1>, scalar_prefetch = 0 : i64, scratch_operands = 0 : i64, tpu.core_type = #tpu.core_type<tc>, window_params = [{transform_indices = @transform_0, window_bounds = array<i64: 304, 32>}, {pipeline_mode = #tpu.pipeline_mode<synchronous>, transform_indices = @transform_1, window_bounds = array<i64: 32, 64>}, {pipeline_mode = #tpu.pipeline_mode<synchronous>, transform_indices = @transform_2, window_bounds = array<i64: 1, 64>}, {pipeline_mode = #tpu.pipeline_mode<synchronous>, transform_indices = @transform_3, window_bounds = array<i64: 64, 128>}, {pipeline_mode = #tpu.pipeline_mode<synchronous>, transform_indices = @transform_4, window_bounds = array<i64: 1, 128>}, {transform_indices = @transform_5, window_bounds = array<i64: 304, 128>}]} {
    %c0 = arith.constant 0 : index
    %c0_0 = arith.constant 0 : index
    %0 = vector.load %arg1[%c0, %c0_0] : memref<304x32xbf16, #tpu.memory_space<vmem>>, vector<304x32xbf16>
    %c0_1 = arith.constant 0 : index
    %c0_2 = arith.constant 0 : index
    %1 = vector.load %arg2[%c0_1, %c0_2] : memref<32x64xbf16, #tpu.memory_space<vmem>>, vector<32x64xbf16>
    %cst = arith.constant dense<0.000000e+00> : vector<304x64xf32>
    %2 = tpu.matmul %0, %1, %cst {dimension_numbers = #tpu.dot_dimension_numbers<[1], [0], [0], [1], [0, 0, 1, 1], [], []>} : vector<304x32xbf16>, vector<32x64xbf16>, vector<304x64xf32> -> vector<304x64xf32>
    %c0_3 = arith.constant 0 : index
    %c0_4 = arith.constant 0 : index
    %3 = vector.load %arg3[%c0_3, %c0_4] : memref<1x64xf32, #tpu.memory_space<vmem>>, vector<1x64xf32>
    %4 = vector.broadcast %3 : vector<1x64xf32> to vector<304x64xf32>
    %5 = arith.addf %2, %4 : vector<304x64xf32>
    %cst_5 = arith.constant 0.000000e+00 : f32
    %6 = vector.broadcast %cst_5 : f32 to vector<304x64xf32>
    %7 = arith.maximumf %5, %6 : vector<304x64xf32>
    %8 = arith.truncf %7 : vector<304x64xf32> to vector<304x64xbf16>
    %c0_6 = arith.constant 0 : index
    %c0_7 = arith.constant 0 : index
    %9 = vector.load %arg4[%c0_6, %c0_7] : memref<64x128xbf16, #tpu.memory_space<vmem>>, vector<64x128xbf16>
    %cst_8 = arith.constant dense<0.000000e+00> : vector<304x128xf32>
    %10 = tpu.matmul %8, %9, %cst_8 {dimension_numbers = #tpu.dot_dimension_numbers<[1], [0], [0], [1], [0, 0, 1, 1], [], []>} : vector<304x64xbf16>, vector<64x128xbf16>, vector<304x128xf32> -> vector<304x128xf32>
    %c0_9 = arith.constant 0 : index
    %c0_10 = arith.constant 0 : index
    %11 = vector.load %arg5[%c0_9, %c0_10] : memref<1x128xf32, #tpu.memory_space<vmem>>, vector<1x128xf32>
    %12 = vector.broadcast %11 : vector<1x128xf32> to vector<304x128xf32>
    %13 = arith.addf %10, %12 : vector<304x128xf32>
    %14 = arith.truncf %13 : vector<304x128xf32> to vector<304x128xbf16>
    %c0_11 = arith.constant 0 : index
    %c0_12 = arith.constant 0 : index
    %15 = vector.load %arg6[%c0_11, %c0_12] : memref<304x128xbf16, #tpu.memory_space<vmem>>, vector<304x128xbf16>
    tpu.vector_store %arg6[%c0_11, %c0_12], %14 {strides = array<i32>} : memref<304x128xbf16, #tpu.memory_space<vmem>>, vector<304x128xbf16>,
    return
  }
  func.func @transform_0(%arg0: i32) -> (i32, i32) {
    %c0_i32 = arith.constant 0 : i32
    %c0_i32_0 = arith.constant 0 : i32
    return %arg0, %c0_i32 : i32, i32
  }
  func.func @transform_1(%arg0: i32) -> (i32, i32) {
    %c0_i32 = arith.constant 0 : i32
    %c0_i32_0 = arith.constant 0 : i32
    %c0_i32_1 = arith.constant 0 : i32
    return %c0_i32, %c0_i32_0 : i32, i32
  }
  func.func @transform_2(%arg0: i32) -> (i32, i32) {
    %c0_i32 = arith.constant 0 : i32
    %c0_i32_0 = arith.constant 0 : i32
    %c0_i32_1 = arith.constant 0 : i32
    return %c0_i32, %c0_i32_0 : i32, i32
  }
  func.func @transform_3(%arg0: i32) -> (i32, i32) {
    %c0_i32 = arith.constant 0 : i32
    %c0_i32_0 = arith.constant 0 : i32
    %c0_i32_1 = arith.constant 0 : i32
    return %c0_i32, %c0_i32_0 : i32, i32
  }
  func.func @transform_4(%arg0: i32) -> (i32, i32) {
    %c0_i32 = arith.constant 0 : i32
    %c0_i32_0 = arith.constant 0 : i32
    %c0_i32_1 = arith.constant 0 : i32
    return %c0_i32, %c0_i32_0 : i32, i32
  }
  func.func @transform_5(%arg0: i32) -> (i32, i32) {
    %c0_i32 = arith.constant 0 : i32
    %c0_i32_0 = arith.constant 0 : i32
    return %arg0, %c0_i32 : i32, i32
  }
}

</mosaic_0001>

<bundles_post_ra>
// kernel: model_forward.1
= control target key start
LH: loop header
LB: loop body
LE: loop exit
PB: predicated region body
PF: predicated region fallthrough
CT: control target
= control target key end

     0   :  { %v1442_v0 = vmov 0.0   ;;  %vm1443_vm0 = vmmov 0   ;;  %vm177_vm1 = vcmask 261120   ;;  %vm516_vm2 = vcmask 523264   ;;  %s1812_s1 = inlined_call_operand.vmem [shape: bf16[32,64], index: 1, kind: input, shape index: {}]   ;;  %s1813_s0 = inlined_call_operand.vmem [shape: bf16[304,32], index: 0, kind: input, shape index: {}]   ;;  %s1814_s3 = inlined_call_operand.vmem [shape: bf16[64,128], index: 3, kind: input, shape index: {}]   ;;  %s1815_s2 = inlined_call_operand.vmem [shape: f32[1,64], index: 2, kind: input, shape index: {}]   ;;  %s1816_s4 = inlined_call_operand.vmem [shape: f32[1,128], index: 4, kind: input, shape index: {}]   ;;  %s1817_s5 = inlined_call_operand.vmem [shape: bf16[304,128], index: 5, kind: output, shape index: {}]  }
   0x1   :  { %1251 = vmatprep.subr.bf16.mxu0 %v1442_v0  ;;  %v1417_v1 = vld [vmem:[%s1812_s1 + $0x8] sm:$0xff]   ;;  %1255 = vmatprep.mubr.msk.bf16.mxu0 %vm1443_vm0, %v1442_v0  ;;  %v1418_v2 = vld [vmem:[%s1812_s1] sm:$0xff]   ;;  %v1421_v5 = vld [vmem:[%s1813_s0 + $0x10] sm:$0xff]  }
   0x2   :  { %1331 = vmatprep.subr.bf16.mxu1 %v1442_v0  ;;  %1339 = vmatprep.mubr.msk.bf16.mxu1 %vm1443_vm0, %v1442_v0  ;;  %v1419_v3 = vld [vmem:[%s1813_s0] sm:$0xff]   ;;  %v1420_v4 = vld [vmem:[%s1813_s0 + $0x8] sm:$0xff]   ;;  %v1438_v6 = vld [vmem:[%s1814_s3 + $0x18] sm:$0xff]  }
   0x3   :  { %1252 = vmatpush3.bf16.msra.mxu0 %v1417_v1  ;;  %1332 = vmatpush3.bf16.msra.mxu1 %v1438_v6  ;;  %v1422_v7 = vld [vmem:[%s1813_s0 + $0x18] sm:$0xff]   ;;  %v1423_v8 = vld [vmem:[%s1813_s0 + $0x20] sm:$0xff]   ;;  %v1424_v9 = vld [vmem:[%s1813_s0 + $0x28] sm:$0xff]  }
   0x4   :  { %1253 = vmatprep.subr.bf16.mxu0 %v1442_v0  ;;  %1333 = vmatprep.subr.bf16.mxu1 %v1442_v0  ;;  %v1425_v10 = vld [vmem:[%s1813_s0 + $0x30] sm:$0xff]   ;;  %v1426_v11 = vld [vmem:[%s1813_s0 + $0x38] sm:$0xff]   ;;  %v1427_v12 = vld [vmem:[%s1813_s0 + $0x40] sm:$0xff]  }
   0x5   :  { %v1439_v13 = vld [vmem:[%s1814_s3 + $0x10] sm:$0xff]   ;;  %v1440_v14 = vld [vmem:[%s1814_s3 + $0x8] sm:$0xff]   ;;  %v1441_v16 = vld [vmem:[%s1814_s3] sm:$0xff]  }
   0x6   :  { %v1428_v15 = vld [vmem:[%s1813_s0 + $0x48] sm:$0xff]   ;;  %v1429_v17 = vld [vmem:[%s1813_s0 + $0x50] sm:$0xff]   ;;  %v1430_v18 = vld [vmem:[%s1813_s0 + $0x58] sm:$0xff]  }
   0x7   :  { %1254 = vmatpush3.bf16.msra.mxu0 %v1418_v2  ;;  %1334 = vmatpush3.bf16.msra.mxu1 %v1439_v13  ;;  %v1431_v19 = vld [vmem:[%s1813_s0 + $0x60] sm:$0xff]   ;;  %v1432_v20 = vld [vmem:[%s1813_s0 + $0x68] sm:$0xff]   ;;  %v1433_v21 = vld [vmem:[%s1813_s0 + $0x70] sm:$0xff]  }
   0x8   :  { %1335 = vmatprep.subr.bf16.mxu1 %v1442_v0  ;;  %v1434_v22 = vld [vmem:[%s1813_s0 + $0x78] sm:$0xff]   ;;  %v1435_v23 = vld [vmem:[%s1813_s0 + $0x80] sm:$0xff]   ;;  %v1436_v24 = vld [vmem:[%s1813_s0 + $0x88] sm:$0xff]  }
   0x9   :  { %v1437_v25 = vld [vmem:[%s1813_s0 + $0x90] sm:$0xff]   ;;  %v1617_v26 = vld [vmem:[%s1815_s2] ss:$0 sm:$0xff] }
   0xa   :  { %1256 = vmatmul.mubr.msk.bf16.vlgmr.msra.gmra.mxu0 %vm177_vm1, %v1419_v3 }
   0xb   :  { %1259 = vmatprep.mubr.msk.bf16.mxu0 %vm1443_vm0, %v1442_v0  ;;  %1336 = vmatpush3.bf16.msra.mxu1 %v1440_v14 }
   0xc   :  { %1337 = vmatprep.subr.bf16.mxu1 %v1442_v0 }
   0xf   :  { %1338 = vmatpush3.bf16.msra.mxu1 %v1441_v16 }
  0x12   :  { %1260 = vmatmul.mubr.msk.bf16.gmra.mxu0 %vm177_vm1, %v1420_v4 }
  0x13   :  { %1263 = vmatprep.mubr.msk.bf16.mxu0 %vm1443_vm0, %v1442_v0 }
  0x1a   :  { %1264 = vmatmul.mubr.msk.bf16.gmra.mxu0 %vm177_vm1, %v1421_v5 }
  0x1b   :  { %1267 = vmatprep.mubr.msk.bf16.mxu0 %vm1443_vm0, %v1442_v0 }
  0x22   :  { %1268 = vmatmul.mubr.msk.bf16.gmra.mxu0 %vm177_vm1, %v1422_v7 }
  0x23   :  { %1271 = vmatprep.mubr.msk.bf16.mxu0 %vm1443_vm0, %v1442_v0 }
  0x2a   :  { %1272 = vmatmul.mubr.msk.bf16.gmra.mxu0 %vm177_vm1, %v1423_v8 }
  0x2b   :  { %1275 = vmatprep.mubr.msk.bf16.mxu0 %vm1443_vm0, %v1442_v0 }
  0x32   :  { %1276 = vmatmul.mubr.msk.bf16.gmra.mxu0 %vm177_vm1, %v1424_v9 }
  0x33   :  { %1279 = vmatprep.mubr.msk.bf16.mxu0 %vm1443_vm0, %v1442_v0 }
  0x3a   :  { %1280 = vmatmul.mubr.msk.bf16.gmra.mxu0 %vm177_vm1, %v1425_v10 }
  0x3b   :  { %1283 = vmatprep.mubr.msk.bf16.mxu0 %vm1443_vm0, %v1442_v0 }
  0x42   :  { %1284 = vmatmul.mubr.msk.bf16.gmra.mxu0 %vm177_vm1, %v1426_v11 }
  0x43   :  { %1287 = vmatprep.mubr.msk.bf16.mxu0 %vm1443_vm0, %v1442_v0 }
  0x4a   :  { %1288 = vmatmul.mubr.msk.bf16.gmra.mxu0 %vm177_vm1, %v1427_v12 }
  0x4b   :  { %1291 = vmatprep.mubr.msk.bf16.mxu0 %vm1443_vm0, %v1442_v0 }
  0x52   :  { %1292 = vmatmul.mubr.msk.bf16.gmra.mxu0 %vm177_vm1, %v1428_v15 }
  0x53   :  { %1295 = vmatprep.mubr.msk.bf16.mxu0 %vm1443_vm0, %v1442_v0 }
  0x5a   :  { %1296 = vmatmul.mubr.msk.bf16.gmra.mxu0 %vm177_vm1, %v1429_v17 }
  0x5b   :  { %1299 = vmatprep.mubr.msk.bf16.mxu0 %vm1443_vm0, %v1442_v0 }
  0x62   :  { %1300 = vmatmul.mubr.msk.bf16.gmra.mxu0 %vm177_vm1, %v1430_v18 }
  0x63   :  { %1303 = vmatprep.mubr.msk.bf16.mxu0 %vm1443_vm0, %v1442_v0 }
  0x6a   :  { %1304 = vmatmul.mubr.msk.bf16.gmra.mxu0 %vm177_vm1, %v1431_v19 }
  0x6b   :  { %1307 = vmatprep.mubr.msk.bf16.mxu0 %vm1443_vm0, %v1442_v0 }
  0x72   :  { %1308 = vmatmul.mubr.msk.bf16.gmra.mxu0 %vm177_vm1, %v1432_v20 }
  0x73   :  { %1311 = vmatprep.mubr.msk.bf16.mxu0 %vm1443_vm0, %v1442_v0 }
  0x7a   :  { %1312 = vmatmul.mubr.msk.bf16.gmra.mxu0 %vm177_vm1, %v1433_v21 }
  0x7b   :  { %1315 = vmatprep.mubr.msk.bf16.mxu0 %vm1443_vm0, %v1442_v0 }
  0x82   :  { %1316 = vmatmul.mubr.msk.bf16.gmra.mxu0 %vm177_vm1, %v1434_v22 }
  0x83   :  { %1319 = vmatprep.mubr.msk.bf16.mxu0 %vm1443_vm0, %v1442_v0 }
  0x8a   :  { %1320 = vmatmul.mubr.msk.bf16.gmra.mxu0 %vm177_vm1, %v1435_v23 }
  0x8b   :  { %1323 = vmatprep.mubr.msk.bf16.mxu0 %vm1443_vm0, %v1442_v0 }
  0x92   :  { %1324 = vmatmul.mubr.msk.bf16.gmra.mxu0 %vm177_vm1, %v1436_v24 }
  0x93   :  { %1327 = vmatprep.mubr.msk.bf16.mxu0 %vm1443_vm0, %v1442_v0 }
  0x9a   :  { %1328 = vmatmul.mubr.msk.bf16.gmra.mxu0 %vm177_vm1, %v1437_v25 }
  0xca   :  { %v269_v27 = vpop.f32.mrf.mxu0 }
  0xcb   :  { %v270_v29 = vadd.f32 %v1617_v26, %v269_v27 }
  0xcc   :  { %v1257_v28 = vpop.f32.mrf.mxu0 }
  0xcd   :  { %v420_v33 = vmax.f32 %v270_v29, 0.0 }
  0xce   :  { %v272_v30 = vpop.f32.mrf.mxu0 }
  0xcf   :  { %v273_v31 = vadd.f32 %v1617_v26, %v272_v30 }
  0xd0   :  { %v1258_v32 = vpop.f32.mrf.mxu0 }
  0xd1   :  { %v421_v34 = vmax.f32 %v273_v31, 0.0 }
  0xd2   :  { %v277_v35 = vpop.f32.mrf.mxu0 }
  0xd3   :  { %v458_v36 = vpack.c.bf16 %v421_v34, %v420_v33  ;;  %v278_v38 = vadd.f32 %v1617_v26, %v277_v35 }
  0xd4   :  { %v1261_v37 = vpop.f32.mrf.mxu0 }
  0xd5   :  { %1340 = vmatmul.mubr.msk.bf16.vlgmr.msra.gmra.mxu1 %vm516_vm2, %v458_v36  ;;  %v422_v42 = vmax.f32 %v278_v38, 0.0 }
  0xd6   :  { %v280_v39 = vpop.f32.mrf.mxu0  ;;  %1343 = vmatprep.mubr.msk.bf16.mxu1 %vm1443_vm0, %v1442_v0 }
  0xd7   :  { %v281_v40 = vadd.f32 %v1617_v26, %v280_v39 }
  0xd8   :  { %v1262_v41 = vpop.f32.mrf.mxu0 }
  0xd9   :  { %v423_v43 = vmax.f32 %v281_v40, 0.0 }
  0xda   :  { %v285_v44 = vpop.f32.mrf.mxu0 }
  0xdb   :  { %v459_v45 = vpack.c.bf16 %v423_v43, %v422_v42  ;;  %v286_v47 = vadd.f32 %v1617_v26, %v285_v44 }
  0xdc   :  { %v1265_v46 = vpop.f32.mrf.mxu0 }
  0xdd   :  { %1344 = vmatmul.mubr.msk.bf16.gmra.mxu1 %vm516_vm2, %v459_v45  ;;  %v424_v51 = vmax.f32 %v286_v47, 0.0 }
  0xde   :  { %v288_v48 = vpop.f32.mrf.mxu0  ;;  %1347 = vmatprep.mubr.msk.bf16.mxu1 %vm1443_vm0, %v1442_v0 }
  0xdf   :  { %v289_v49 = vadd.f32 %v1617_v26, %v288_v48 }
  0xe0   :  { %v1266_v50 = vpop.f32.mrf.mxu0 }
  0xe1   :  { %v425_v52 = vmax.f32 %v289_v49, 0.0 }
  0xe2   :  { %v293_v53 = vpop.f32.mrf.mxu0 }
  0xe3   :  { %v460_v54 = vpack.c.bf16 %v425_v52, %v424_v51  ;;  %v294_v56 = vadd.f32 %v1617_v26, %v293_v53 }
  0xe4   :  { %v1269_v55 = vpop.f32.mrf.mxu0 }
  0xe5   :  { %1348 = vmatmul.mubr.msk.bf16.gmra.mxu1 %vm516_vm2, %v460_v54  ;;  %v426_v60 = vmax.f32 %v294_v56, 0.0 }
  0xe6   :  { %v296_v57 = vpop.f32.mrf.mxu0  ;;  %1351 = vmatprep.mubr.msk.bf16.mxu1 %vm1443_vm0, %v1442_v0 }
  0xe7   :  { %v297_v58 = vadd.f32 %v1617_v26, %v296_v57 }
  0xe8   :  { %v1270_v59 = vpop.f32.mrf.mxu0 }
  0xe9   :  { %v427_v61 = vmax.f32 %v297_v58, 0.0 }
  0xea   :  { %v301_v62 = vpop.f32.mrf.mxu0 }
  0xeb   :  { %v461_v63 = vpack.c.bf16 %v427_v61, %v426_v60  ;;  %v302_v2 = vadd.f32 %v1617_v26, %v301_v62 }
  0xec   :  { %v1273_v1 = vpop.f32.mrf.mxu0 }
  0xed   :  { %1352 = vmatmul.mubr.msk.bf16.gmra.mxu1 %vm516_vm2, %v461_v63  ;;  %v428_v6 = vmax.f32 %v302_v2, 0.0 }
  0xee   :  { %v304_v3 = vpop.f32.mrf.mxu0  ;;  %1355 = vmatprep.mubr.msk.bf16.mxu1 %vm1443_vm0, %v1442_v0 }
  0xef   :  { %v305_v4 = vadd.f32 %v1617_v26, %v304_v3 }
  0xf0   :  { %v1274_v5 = vpop.f32.mrf.mxu0 }
  0xf1   :  { %v429_v7 = vmax.f32 %v305_v4, 0.0 }
  0xf2   :  { %v309_v8 = vpop.f32.mrf.mxu0 }
  0xf3   :  { %v462_v9 = vpack.c.bf16 %v429_v7, %v428_v6  ;;  %v310_v11 = vadd.f32 %v1617_v26, %v309_v8 }
  0xf4   :  { %v1277_v10 = vpop.f32.mrf.mxu0 }
  0xf5   :  { %1356 = vmatmul.mubr.msk.bf16.gmra.mxu1 %vm516_vm2, %v462_v9  ;;  %v430_v15 = vmax.f32 %v310_v11, 0.0 }
  0xf6   :  { %v312_v12 = vpop.f32.mrf.mxu0  ;;  %1359 = vmatprep.mubr.msk.bf16.mxu1 %vm1443_vm0, %v1442_v0 }
  0xf7   :  { %v313_v13 = vadd.f32 %v1617_v26, %v312_v12 }
  0xf8   :  { %v1278_v14 = vpop.f32.mrf.mxu0 }
  0xf9   :  { %v431_v16 = vmax.f32 %v313_v13, 0.0 }
  0xfa   :  { %v317_v17 = vpop.f32.mrf.mxu0 }
  0xfb   :  { %v463_v18 = vpack.c.bf16 %v431_v16, %v430_v15  ;;  %v318_v20 = vadd.f32 %v1617_v26, %v317_v17 }
  0xfc   :  { %v1281_v19 = vpop.f32.mrf.mxu0 }
  0xfd   :  { %1360 = vmatmul.mubr.msk.bf16.gmra.mxu1 %vm516_vm2, %v463_v18  ;;  %v432_v24 = vmax.f32 %v318_v20, 0.0 }
  0xfe   :  { %v320_v21 = vpop.f32.mrf.mxu0  ;;  %1363 = vmatprep.mubr.msk.bf16.mxu1 %vm1443_vm0, %v1442_v0 }
  0xff   :  { %v321_v22 = vadd.f32 %v1617_v26, %v320_v21 }
 0x100   :  { %v1282_v23 = vpop.f32.mrf.mxu0 }
 0x101   :  { %v433_v25 = vmax.f32 %v321_v22, 0.0 }
 0x102   :  { %v325_v27 = vpop.f32.mrf.mxu0 }
 0x103   :  { %v464_v28 = vpack.c.bf16 %v433_v25, %v432_v24  ;;  %v326_v30 = vadd.f32 %v1617_v26, %v325_v27 }
 0x104   :  { %v1285_v29 = vpop.f32.mrf.mxu0 }
 0x105   :  { %1364 = vmatmul.mubr.msk.bf16.gmra.mxu1 %vm516_vm2, %v464_v28  ;;  %v434_v34 = vmax.f32 %v326_v30, 0.0 }
 0x106   :  { %v328_v31 = vpop.f32.mrf.mxu0  ;;  %1367 = vmatprep.mubr.msk.bf16.mxu1 %vm1443_vm0, %v1442_v0 }
 0x107   :  { %v329_v32 = vadd.f32 %v1617_v26, %v328_v31 }
 0x108   :  { %v1286_v33 = vpop.f32.mrf.mxu0 }
 0x109   :  { %v435_v35 = vmax.f32 %v329_v32, 0.0 }
 0x10a   :  { %v333_v36 = vpop.f32.mrf.mxu0 }
 0x10b   :  { %v465_v37 = vpack.c.bf16 %v435_v35, %v434_v34  ;;  %v334_v39 = vadd.f32 %v1617_v26, %v333_v36 }
 0x10c   :  { %v1289_v38 = vpop.f32.mrf.mxu0 }
 0x10d   :  { %1368 = vmatmul.mubr.msk.bf16.gmra.mxu1 %vm516_vm2, %v465_v37  ;;  %v436_v43 = vmax.f32 %v334_v39, 0.0 }
 0x10e   :  { %v336_v40 = vpop.f32.mrf.mxu0  ;;  %1371 = vmatprep.mubr.msk.bf16.mxu1 %vm1443_vm0, %v1442_v0 }
 0x10f   :  { %v337_v41 = vadd.f32 %v1617_v26, %v336_v40 }
 0x110   :  { %v1290_v42 = vpop.f32.mrf.mxu0 }
 0x111   :  { %v437_v44 = vmax.f32 %v337_v41, 0.0 }
 0x112   :  { %v341_v45 = vpop.f32.mrf.mxu0 }
 0x113   :  { %v466_v46 = vpack.c.bf16 %v437_v44, %v436_v43  ;;  %v342_v48 = vadd.f32 %v1617_v26, %v341_v45 }
 0x114   :  { %v1293_v47 = vpop.f32.mrf.mxu0 }
 0x115   :  { %1372 = vmatmul.mubr.msk.bf16.gmra.mxu1 %vm516_vm2, %v466_v46  ;;  %v438_v52 = vmax.f32 %v342_v48, 0.0 }
 0x116   :  { %v344_v49 = vpop.f32.mrf.mxu0  ;;  %1375 = vmatprep.mubr.msk.bf16.mxu1 %vm1443_vm0, %v1442_v0 }
 0x117   :  { %v345_v50 = vadd.f32 %v1617_v26, %v344_v49 }
 0x118   :  { %v1294_v51 = vpop.f32.mrf.mxu0 }
 0x119   :  { %v439_v53 = vmax.f32 %v345_v50, 0.0 }
 0x11a   :  { %v349_v54 = vpop.f32.mrf.mxu0 }
 0x11b   :  { %v467_v55 = vpack.c.bf16 %v439_v53, %v438_v52  ;;  %v350_v57 = vadd.f32 %v1617_v26, %v349_v54 }
 0x11c   :  { %v1297_v56 = vpop.f32.mrf.mxu0 }
 0x11d   :  { %1376 = vmatmul.mubr.msk.bf16.gmra.mxu1 %vm516_vm2, %v467_v55  ;;  %v440_v61 = vmax.f32 %v350_v57, 0.0 }
 0x11e   :  { %v352_v58 = vpop.f32.mrf.mxu0  ;;  %1379 = vmatprep.mubr.msk.bf16.mxu1 %vm1443_vm0, %v1442_v0 }
 0x11f   :  { %v353_v59 = vadd.f32 %v1617_v26, %v352_v58 }
 0x120   :  { %v1298_v60 = vpop.f32.mrf.mxu0 }
 0x121   :  { %v441_v62 = vmax.f32 %v353_v59, 0.0 }
 0x122   :  { %v357_v63 = vpop.f32.mrf.mxu0 }
 0x123   :  { %v468_v1 = vpack.c.bf16 %v441_v62, %v440_v61  ;;  %v358_v3 = vadd.f32 %v1617_v26, %v357_v63 }
 0x124   :  { %v1301_v2 = vpop.f32.mrf.mxu0 }
 0x125   :  { %1380 = vmatmul.mubr.msk.bf16.gmra.mxu1 %vm516_vm2, %v468_v1  ;;  %v442_v7 = vmax.f32 %v358_v3, 0.0 }
 0x126   :  { %v360_v4 = vpop.f32.mrf.mxu0  ;;  %1383 = vmatprep.mubr.msk.bf16.mxu1 %vm1443_vm0, %v1442_v0 }
 0x127   :  { %v361_v5 = vadd.f32 %v1617_v26, %v360_v4 }
 0x128   :  { %v1302_v6 = vpop.f32.mrf.mxu0 }
 0x129   :  { %v443_v8 = vmax.f32 %v361_v5, 0.0 }
 0x12a   :  { %v365_v9 = vpop.f32.mrf.mxu0 }
 0x12b   :  { %v469_v10 = vpack.c.bf16 %v443_v8, %v442_v7  ;;  %v366_v12 = vadd.f32 %v1617_v26, %v365_v9 }
 0x12c   :  { %v1305_v11 = vpop.f32.mrf.mxu0 }
 0x12d   :  { %1384 = vmatmul.mubr.msk.bf16.gmra.mxu1 %vm516_vm2, %v469_v10  ;;  %v444_v16 = vmax.f32 %v366_v12, 0.0  ;;  %v1715_v12 = vld [vmem:[%s1816_s4] ss:$0 sm:$0xff] }
 0x12e   :  { %v368_v13 = vpop.f32.mrf.mxu0  ;;  %1387 = vmatprep.mubr.msk.bf16.mxu1 %vm1443_vm0, %v1442_v0 }
 0x12f   :  { %v369_v14 = vadd.f32 %v1617_v26, %v368_v13 }
 0x130   :  { %v1306_v15 = vpop.f32.mrf.mxu0 }
 0x131   :  { %v445_v17 = vmax.f32 %v369_v14, 0.0 }
 0x132   :  { %v373_v18 = vpop.f32.mrf.mxu0 }
 0x133   :  { %v470_v19 = vpack.c.bf16 %v445_v17, %v444_v16  ;;  %v374_v21 = vadd.f32 %v1617_v26, %v373_v18 }
 0x134   :  { %v1309_v20 = vpop.f32.mrf.mxu0 }
 0x135   :  { %1388 = vmatmul.mubr.msk.bf16.gmra.mxu1 %vm516_vm2, %v470_v19  ;;  %v446_v25 = vmax.f32 %v374_v21, 0.0 }
 0x136   :  { %v376_v22 = vpop.f32.mrf.mxu0  ;;  %1391 = vmatprep.mubr.msk.bf16.mxu1 %vm1443_vm0, %v1442_v0 }
 0x137   :  { %v377_v23 = vadd.f32 %v1617_v26, %v376_v22 }
 0x138   :  { %v1310_v24 = vpop.f32.mrf.mxu0 }
 0x139   :  { %v447_v27 = vmax.f32 %v377_v23, 0.0 }
 0x13a   :  { %v381_v28 = vpop.f32.mrf.mxu0 }
 0x13b   :  { %v471_v29 = vpack.c.bf16 %v447_v27, %v446_v25  ;;  %v382_v31 = vadd.f32 %v1617_v26, %v381_v28 }
 0x13c   :  { %v1313_v30 = vpop.f32.mrf.mxu0 }
 0x13d   :  { %1392 = vmatmul.mubr.msk.bf16.gmra.mxu1 %vm516_vm2, %v471_v29  ;;  %v448_v35 = vmax.f32 %v382_v31, 0.0 }
 0x13e   :  { %v384_v32 = vpop.f32.mrf.mxu0  ;;  %1395 = vmatprep.mubr.msk.bf16.mxu1 %vm1443_vm0, %v1442_v0 }
 0x13f   :  { %v385_v33 = vadd.f32 %v1617_v26, %v384_v32 }
 0x140   :  { %v1314_v34 = vpop.f32.mrf.mxu0 }
 0x141   :  { %v449_v36 = vmax.f32 %v385_v33, 0.0 }
 0x142   :  { %v389_v37 = vpop.f32.mrf.mxu0 }
 0x143   :  { %v472_v38 = vpack.c.bf16 %v449_v36, %v448_v35  ;;  %v390_v40 = vadd.f32 %v1617_v26, %v389_v37 }
 0x144   :  { %v1317_v39 = vpop.f32.mrf.mxu0 }
 0x145   :  { %1396 = vmatmul.mubr.msk.bf16.gmra.mxu1 %vm516_vm2, %v472_v38  ;;  %v450_v44 = vmax.f32 %v390_v40, 0.0 }
 0x146   :  { %v392_v41 = vpop.f32.mrf.mxu0  ;;  %1399 = vmatprep.mubr.msk.bf16.mxu1 %vm1443_vm0, %v1442_v0 }
 0x147   :  { %v393_v42 = vadd.f32 %v1617_v26, %v392_v41 }
 0x148   :  { %v1318_v43 = vpop.f32.mrf.mxu0 }
 0x149   :  { %v451_v45 = vmax.f32 %v393_v42, 0.0 }
 0x14a   :  { %v397_v46 = vpop.f32.mrf.mxu0 }
 0x14b   :  { %v473_v47 = vpack.c.bf16 %v451_v45, %v450_v44  ;;  %v398_v49 = vadd.f32 %v1617_v26, %v397_v46 }
 0x14c   :  { %v1321_v48 = vpop.f32.mrf.mxu0 }
 0x14d   :  { %1400 = vmatmul.mubr.msk.bf16.gmra.mxu1 %vm516_vm2, %v473_v47  ;;  %v452_v53 = vmax.f32 %v398_v49, 0.0 }
 0x14e   :  { %v400_v50 = vpop.f32.mrf.mxu0  ;;  %1403 = vmatprep.mubr.msk.bf16.mxu1 %vm1443_vm0, %v1442_v0 }
 0x14f   :  { %v401_v51 = vadd.f32 %v1617_v26, %v400_v50 }
 0x150   :  { %v1322_v52 = vpop.f32.mrf.mxu0 }
 0x151   :  { %v453_v54 = vmax.f32 %v401_v51, 0.0 }
 0x152   :  { %v405_v55 = vpop.f32.mrf.mxu0 }
 0x153   :  { %v474_v56 = vpack.c.bf16 %v453_v54, %v452_v53  ;;  %v406_v58 = vadd.f32 %v1617_v26, %v405_v55 }
 0x154   :  { %v1325_v57 = vpop.f32.mrf.mxu0 }
 0x155   :  { %1404 = vmatmul.mubr.msk.bf16.gmra.mxu1 %vm516_vm2, %v474_v56  ;;  %v454_v62 = vmax.f32 %v406_v58, 0.0 }
 0x156   :  { %v408_v59 = vpop.f32.mrf.mxu0  ;;  %1407 = vmatprep.mubr.msk.bf16.mxu1 %vm1443_vm0, %v1442_v0 }
 0x157   :  { %v409_v60 = vadd.f32 %v1617_v26, %v408_v59 }
 0x158   :  { %v1326_v61 = vpop.f32.mrf.mxu0 }
 0x159   :  { %v455_v63 = vmax.f32 %v409_v60, 0.0 }
 0x15a   :  { %v413_v1 = vpop.f32.mrf.mxu0 }
 0x15b   :  { %v475_v2 = vpack.c.bf16 %v455_v63, %v454_v62  ;;  %v414_v4 = vadd.f32 %v1617_v26, %v413_v1 }
 0x15c   :  { %v1329_v3 = vpop.f32.mrf.mxu0 }
 0x15d   :  { %1408 = vmatmul.mubr.msk.bf16.gmra.mxu1 %vm516_vm2, %v475_v2  ;;  %v456_v8 = vmax.f32 %v414_v4, 0.0 }
 0x15e   :  { %v416_v5 = vpop.f32.mrf.mxu0  ;;  %1411 = vmatprep.mubr.msk.bf16.mxu1 %vm1443_vm0, %v1442_v0 }
 0x15f   :  { %v417_v6 = vadd.f32 %v1617_v26, %v416_v5 }
 0x160   :  { %v1330_v7 = vpop.f32.mrf.mxu0 }
 0x161   :  { %v457_v9 = vmax.f32 %v417_v6, 0.0 }
 0x163   :  { %v476_v10 = vpack.c.bf16 %v457_v9, %v456_v8 }
 0x165   :  { %1412 = vmatmul.mubr.msk.bf16.gmra.mxu1 %vm516_vm2, %v476_v10 }
 0x195   :  { %v608_v11 = vpop.f32.mrf.mxu1 }
 0x196   :  { %v609_v15 = vadd.f32 %v1715_v12, %v608_v11 }
 0x197   :  { %v1341_v13 = vpop.f32.mrf.mxu1 }
 0x199   :  { %v611_v14 = vpop.f32.mrf.mxu1 }
 0x19a   :  { %v612_v0 = vadd.f32 %v1715_v12, %v611_v14 }
 0x19b   :  { %v1342_v16 = vpop.f32.mrf.mxu1 }
 0x19c   :  { %v1097_v26 = vpack.c.bf16 %v612_v0, %v609_v15 }
 0x19d   :  { %v616_v17 = vpop.f32.mrf.mxu1 }
 0x19e   :  { %1098 = vst [vmem:[%s1817_s5] sm:$0xff] %v1097_v26   ;;  %v617_v20 = vadd.f32 %v1715_v12, %v616_v17 }
 0x19f   :  { %v1345_v18 = vpop.f32.mrf.mxu1 }
 0x1a1   :  { %v619_v19 = vpop.f32.mrf.mxu1 }
 0x1a2   :  { %v620_v21 = vadd.f32 %v1715_v12, %v619_v19 }
 0x1a3   :  { %v1346_v22 = vpop.f32.mrf.mxu1 }
 0x1a4   :  { %v1102_v23 = vpack.c.bf16 %v620_v21, %v617_v20 }
 0x1a5   :  { %v624_v24 = vpop.f32.mrf.mxu1 }
 0x1a6   :  { %1189 = vst [vmem:[%s1817_s5 + $0x8] sm:$0xff] %v1102_v23   ;;  %v625_v28 = vadd.f32 %v1715_v12, %v624_v24 }
 0x1a7   :  { %v1349_v25 = vpop.f32.mrf.mxu1 }
 0x1a9   :  { %v627_v27 = vpop.f32.mrf.mxu1 }
 0x1aa   :  { %v628_v29 = vadd.f32 %v1715_v12, %v627_v27 }
 0x1ab   :  { %v1350_v30 = vpop.f32.mrf.mxu1 }
 0x1ac   :  { %v1107_v31 = vpack.c.bf16 %v628_v29, %v625_v28 }
 0x1ad   :  { %v632_v32 = vpop.f32.mrf.mxu1 }
 0x1ae   :  { %1190 = vst [vmem:[%s1817_s5 + $0x10] sm:$0xff] %v1107_v31   ;;  %v633_v35 = vadd.f32 %v1715_v12, %v632_v32 }
 0x1af   :  { %v1353_v33 = vpop.f32.mrf.mxu1 }
 0x1b1   :  { %v635_v34 = vpop.f32.mrf.mxu1 }
 0x1b2   :  { %v636_v36 = vadd.f32 %v1715_v12, %v635_v34 }
 0x1b3   :  { %v1354_v37 = vpop.f32.mrf.mxu1 }
 0x1b4   :  { %v1112_v38 = vpack.c.bf16 %v636_v36, %v633_v35 }
 0x1b5   :  { %v640_v39 = vpop.f32.mrf.mxu1 }
 0x1b6   :  { %1191 = vst [vmem:[%s1817_s5 + $0x18] sm:$0xff] %v1112_v38   ;;  %v641_v42 = vadd.f32 %v1715_v12, %v640_v39 }
 0x1b7   :  { %v1357_v40 = vpop.f32.mrf.mxu1 }
 0x1b9   :  { %v643_v41 = vpop.f32.mrf.mxu1 }
 0x1ba   :  { %v644_v43 = vadd.f32 %v1715_v12, %v643_v41 }
 0x1bb   :  { %v1358_v44 = vpop.f32.mrf.mxu1 }
 0x1bc   :  { %v1117_v45 = vpack.c.bf16 %v644_v43, %v641_v42 }
 0x1bd   :  { %v648_v46 = vpop.f32.mrf.mxu1 }
 0x1be   :  { %1192 = vst [vmem:[%s1817_s5 + $0x20] sm:$0xff] %v1117_v45   ;;  %v649_v49 = vadd.f32 %v1715_v12, %v648_v46 }
 0x1bf   :  { %v1361_v47 = vpop.f32.mrf.mxu1 }
 0x1c1   :  { %v651_v48 = vpop.f32.mrf.mxu1 }
 0x1c2   :  { %v652_v50 = vadd.f32 %v1715_v12, %v651_v48 }
 0x1c3   :  { %v1362_v51 = vpop.f32.mrf.mxu1 }
 0x1c4   :  { %v1122_v52 = vpack.c.bf16 %v652_v50, %v649_v49 }
 0x1c5   :  { %v656_v53 = vpop.f32.mrf.mxu1 }
 0x1c6   :  { %1193 = vst [vmem:[%s1817_s5 + $0x28] sm:$0xff] %v1122_v52   ;;  %v657_v56 = vadd.f32 %v1715_v12, %v656_v53 }
 0x1c7   :  { %v1365_v54 = vpop.f32.mrf.mxu1 }
 0x1c9   :  { %v659_v55 = vpop.f32.mrf.mxu1 }
 0x1ca   :  { %v660_v57 = vadd.f32 %v1715_v12, %v659_v55 }
 0x1cb   :  { %v1366_v58 = vpop.f32.mrf.mxu1 }
 0x1cc   :  { %v1127_v59 = vpack.c.bf16 %v660_v57, %v657_v56 }
 0x1cd   :  { %v664_v60 = vpop.f32.mrf.mxu1 }
 0x1ce   :  { %1194 = vst [vmem:[%s1817_s5 + $0x30] sm:$0xff] %v1127_v59   ;;  %v665_v63 = vadd.f32 %v1715_v12, %v664_v60 }
 0x1cf   :  { %v1369_v61 = vpop.f32.mrf.mxu1 }
 0x1d1   :  { %v667_v62 = vpop.f32.mrf.mxu1 }
 0x1d2   :  { %v668_v1 = vadd.f32 %v1715_v12, %v667_v62 }
 0x1d3   :  { %v1370_v2 = vpop.f32.mrf.mxu1 }
 0x1d4   :  { %v1132_v3 = vpack.c.bf16 %v668_v1, %v665_v63 }
 0x1d5   :  { %v672_v4 = vpop.f32.mrf.mxu1 }
 0x1d6   :  { %1195 = vst [vmem:[%s1817_s5 + $0x38] sm:$0xff] %v1132_v3   ;;  %v673_v7 = vadd.f32 %v1715_v12, %v672_v4 }
 0x1d7   :  { %v1373_v5 = vpop.f32.mrf.mxu1 }
 0x1d9   :  { %v675_v6 = vpop.f32.mrf.mxu1 }
 0x1da   :  { %v676_v8 = vadd.f32 %v1715_v12, %v675_v6 }
 0x1db   :  { %v1374_v9 = vpop.f32.mrf.mxu1 }
 0x1dc   :  { %v1137_v10 = vpack.c.bf16 %v676_v8, %v673_v7 }
 0x1dd   :  { %v680_v11 = vpop.f32.mrf.mxu1 }
 0x1de   :  { %1196 = vst [vmem:[%s1817_s5 + $0x40] sm:$0xff] %v1137_v10   ;;  %v681_v15 = vadd.f32 %v1715_v12, %v680_v11 }
 0x1df   :  { %v1377_v13 = vpop.f32.mrf.mxu1 }
 0x1e1   :  { %v683_v14 = vpop.f32.mrf.mxu1 }
 0x1e2   :  { %v684_v0 = vadd.f32 %v1715_v12, %v683_v14 }
 0x1e3   :  { %v1378_v16 = vpop.f32.mrf.mxu1 }
 0x1e4   :  { %v1142_v26 = vpack.c.bf16 %v684_v0, %v681_v15 }
 0x1e5   :  { %v688_v17 = vpop.f32.mrf.mxu1 }
 0x1e6   :  { %1197 = vst [vmem:[%s1817_s5 + $0x48] sm:$0xff] %v1142_v26   ;;  %v689_v20 = vadd.f32 %v1715_v12, %v688_v17 }
 0x1e7   :  { %v1381_v18 = vpop.f32.mrf.mxu1 }
 0x1e9   :  { %v691_v19 = vpop.f32.mrf.mxu1 }
 0x1ea   :  { %v692_v21 = vadd.f32 %v1715_v12, %v691_v19 }
 0x1eb   :  { %v1382_v22 = vpop.f32.mrf.mxu1 }
 0x1ec   :  { %v1147_v23 = vpack.c.bf16 %v692_v21, %v689_v20 }
 0x1ed   :  { %v696_v24 = vpop.f32.mrf.mxu1 }
 0x1ee   :  { %1198 = vst [vmem:[%s1817_s5 + $0x50] sm:$0xff] %v1147_v23   ;;  %v697_v28 = vadd.f32 %v1715_v12, %v696_v24 }
 0x1ef   :  { %v1385_v25 = vpop.f32.mrf.mxu1 }
 0x1f1   :  { %v699_v27 = vpop.f32.mrf.mxu1 }
 0x1f2   :  { %v700_v29 = vadd.f32 %v1715_v12, %v699_v27 }
 0x1f3   :  { %v1386_v30 = vpop.f32.mrf.mxu1 }
 0x1f4   :  { %v1152_v31 = vpack.c.bf16 %v700_v29, %v697_v28 }
 0x1f5   :  { %v704_v32 = vpop.f32.mrf.mxu1 }
 0x1f6   :  { %1199 = vst [vmem:[%s1817_s5 + $0x58] sm:$0xff] %v1152_v31   ;;  %v705_v35 = vadd.f32 %v1715_v12, %v704_v32 }
 0x1f7   :  { %v1389_v33 = vpop.f32.mrf.mxu1 }
 0x1f9   :  { %v707_v34 = vpop.f32.mrf.mxu1 }
 0x1fa   :  { %v708_v36 = vadd.f32 %v1715_v12, %v707_v34 }
 0x1fb   :  { %v1390_v37 = vpop.f32.mrf.mxu1 }
 0x1fc   :  { %v1157_v38 = vpack.c.bf16 %v708_v36, %v705_v35 }
 0x1fd   :  { %v712_v39 = vpop.f32.mrf.mxu1 }
 0x1fe   :  { %1200 = vst [vmem:[%s1817_s5 + $0x60] sm:$0xff] %v1157_v38   ;;  %v713_v42 = vadd.f32 %v1715_v12, %v712_v39 }
 0x1ff   :  { %v1393_v40 = vpop.f32.mrf.mxu1 }
 0x201   :  { %v715_v41 = vpop.f32.mrf.mxu1 }
 0x202   :  { %v716_v43 = vadd.f32 %v1715_v12, %v715_v41 }
 0x203   :  { %v1394_v44 = vpop.f32.mrf.mxu1 }
 0x204   :  { %v1162_v45 = vpack.c.bf16 %v716_v43, %v713_v42 }
 0x205   :  { %v720_v46 = vpop.f32.mrf.mxu1 }
 0x206   :  { %1201 = vst [vmem:[%s1817_s5 + $0x68] sm:$0xff] %v1162_v45   ;;  %v721_v49 = vadd.f32 %v1715_v12, %v720_v46 }
 0x207   :  { %v1397_v47 = vpop.f32.mrf.mxu1 }
 0x209   :  { %v723_v48 = vpop.f32.mrf.mxu1 }
 0x20a   :  { %v724_v50 = vadd.f32 %v1715_v12, %v723_v48 }
 0x20b   :  { %v1398_v51 = vpop.f32.mrf.mxu1 }
 0x20c   :  { %v1167_v52 = vpack.c.bf16 %v724_v50, %v721_v49 }
 0x20d   :  { %v728_v53 = vpop.f32.mrf.mxu1 }
 0x20e   :  { %1202 = vst [vmem:[%s1817_s5 + $0x70] sm:$0xff] %v1167_v52   ;;  %v729_v56 = vadd.f32 %v1715_v12, %v728_v53 }
 0x20f   :  { %v1401_v54 = vpop.f32.mrf.mxu1 }
 0x211   :  { %v731_v55 = vpop.f32.mrf.mxu1 }
 0x212   :  { %v732_v57 = vadd.f32 %v1715_v12, %v731_v55 }
 0x213   :  { %v1402_v58 = vpop.f32.mrf.mxu1 }
 0x214   :  { %v1172_v59 = vpack.c.bf16 %v732_v57, %v729_v56 }
 0x215   :  { %v736_v60 = vpop.f32.mrf.mxu1 }
 0x216   :  { %1203 = vst [vmem:[%s1817_s5 + $0x78] sm:$0xff] %v1172_v59   ;;  %v737_v63 = vadd.f32 %v1715_v12, %v736_v60 }
 0x217   :  { %v1405_v61 = vpop.f32.mrf.mxu1 }
 0x219   :  { %v739_v62 = vpop.f32.mrf.mxu1 }
 0x21a   :  { %v740_v1 = vadd.f32 %v1715_v12, %v739_v62 }
 0x21b   :  { %v1406_v2 = vpop.f32.mrf.mxu1 }
 0x21c   :  { %v1177_v3 = vpack.c.bf16 %v740_v1, %v737_v63 }
 0x21d   :  { %v744_v4 = vpop.f32.mrf.mxu1 }
 0x21e   :  { %1204 = vst [vmem:[%s1817_s5 + $0x80] sm:$0xff] %v1177_v3   ;;  %v745_v7 = vadd.f32 %v1715_v12, %v744_v4 }
 0x21f   :  { %v1409_v5 = vpop.f32.mrf.mxu1 }
 0x221   :  { %v747_v6 = vpop.f32.mrf.mxu1 }
 0x222   :  { %v748_v8 = vadd.f32 %v1715_v12, %v747_v6 }
 0x223   :  { %v1410_v9 = vpop.f32.mrf.mxu1 }
 0x224   :  { %v1182_v10 = vpack.c.bf16 %v748_v8, %v745_v7 }
 0x225   :  { %v752_v11 = vpop.f32.mrf.mxu1 }
 0x226   :  { %1205 = vst [vmem:[%s1817_s5 + $0x88] sm:$0xff] %v1182_v10   ;;  %v753_v15 = vadd.f32 %v1715_v12, %v752_v11 }
 0x227   :  { %v1413_v13 = vpop.f32.mrf.mxu1 }
 0x229   :  { %v755_v14 = vpop.f32.mrf.mxu1 }
 0x22a   :  { %v756_v0 = vadd.f32 %v1715_v12, %v755_v14 }
 0x22b   :  { %v1414_v16 = vpop.f32.mrf.mxu1 }
 0x22c   :  { %v1187_v26 = vpack.c.bf16 %v756_v0, %v753_v15 }
 0x22e   :  { %1206 = vst [vmem:[%s1817_s5 + $0x90] sm:$0xff] %v1187_v26  }

</bundles_post_ra>
